<compile_context>
chip_gen: v7x
topology: tpu7x:2x2x1
jax: 0.10.0
libtpu: 0.0.40
codegen_flags: <defaults>
</compile_context>

<pallas_src>
import jax
import jax.numpy as jnp
from jax.experimental import pallas as pl
from jax.experimental.pallas import tpu as pltpu


def _bottleneck2_kernel(x_ref, w2_ref, w3_ref, s2_ref, b2_ref, s3_ref, b3_ref,
                        out_ref, xpad_s, h_s):
    """Per-grid-step (one batch element), NCL layout.

    x_ref:   (1, C, L)   input block (also the residual)
    w2_ref:  (3, C, C)   conv2 weights, (tap, Cout, Cin)
    w3_ref:  (3, C, C)   conv3 weights, (tap, Cout, Cin)
    s*/b*:   (C, 1)      folded BatchNorm scale / shift (f32)
    out_ref: (1, C, L)
    xpad_s:  (C, L+4)    VMEM scratch: zero-padded input for conv2
    h_s:     (C, L+2)    VMEM scratch: conv2->bn2->relu activation
    """
    C = x_ref.shape[1]
    L = x_ref.shape[2]
    Lm = L + 2  # length after conv2 (k=3, pad=2)

    x = x_ref[0]  # (C, L) in matmul dtype

    # Build the pad=2 input inside VMEM (replaces wrapper-side jnp.pad).
    zpad = jnp.zeros((C, 2), xpad_s.dtype)
    xpad_s[:, 0:2] = zpad
    xpad_s[:, L + 2:L + 4] = zpad
    xpad_s[:, 2:L + 2] = x

    s2 = s2_ref[...]
    b2 = b2_ref[...]
    s3 = s3_ref[...]
    b3 = b3_ref[...]

    # conv2: three taps on the MXU, f32 accumulation, acc starts from tap 0.
    acc = jnp.dot(w2_ref[0], xpad_s[:, 0:Lm],
                  preferred_element_type=jnp.float32)
    acc += jnp.dot(w2_ref[1], xpad_s[:, 1:1 + Lm],
                   preferred_element_type=jnp.float32)
    acc += jnp.dot(w2_ref[2], xpad_s[:, 2:2 + Lm],
                   preferred_element_type=jnp.float32)

    # bn2 + relu (f32 epilogue), stored to VMEM scratch in the matmul dtype.
    h_s[...] = jnp.maximum(acc * s2 + b2, 0.0).astype(h_s.dtype)

    # conv3: k=3, no padding -> back to length L.
    acc = jnp.dot(w3_ref[0], h_s[:, 0:L],
                  preferred_element_type=jnp.float32)
    acc += jnp.dot(w3_ref[1], h_s[:, 1:1 + L],
                   preferred_element_type=jnp.float32)
    acc += jnp.dot(w3_ref[2], h_s[:, 2:2 + L],
                   preferred_element_type=jnp.float32)

    # bn3 + residual + relu, residual read from the same input block (f32).
    o = acc * s3 + b3 + x.astype(jnp.float32)
    out_ref[0] = jnp.maximum(o, 0.0).astype(out_ref.dtype)


def bottleneck2_pallas(x_ncl, w2_oik, w3_oik, s2, b2, s3, b3, *,
                       use_bf16=False):
    """x_ncl: (N, C, L). w*_oik: (Cout, Cin, 3) PyTorch Conv1d layout.

    s*/b*: folded inference-mode BatchNorm scale/shift, shape (C,).
    use_bf16: cast activations/weights to bf16 for the MXU (f32 accumulate,
    f32 epilogue) -- recommended on v6e/v7x per the perf review.
    """
    N, C, L = x_ncl.shape
    assert w2_oik.shape == (C, C, 3) and w3_oik.shape == (C, C, 3), (
        "Implemented path requires x channels == planes "
        "(stride=1, downsample=None; adjust_channels branch is dead).")

    out_dtype = x_ncl.dtype
    mm_dtype = jnp.bfloat16 if use_bf16 else x_ncl.dtype

    x = x_ncl.astype(mm_dtype)
    w2_t = jnp.transpose(w2_oik, (2, 0, 1)).astype(mm_dtype)  # (3, Cout, Cin)
    w3_t = jnp.transpose(w3_oik, (2, 0, 1)).astype(mm_dtype)
    s2b = s2.reshape(C, 1).astype(jnp.float32)
    b2b = b2.reshape(C, 1).astype(jnp.float32)
    s3b = s3.reshape(C, 1).astype(jnp.float32)
    b3b = b3.reshape(C, 1).astype(jnp.float32)

    grid_spec = pltpu.PrefetchScalarGridSpec(
        num_scalar_prefetch=0,
        grid=(N,),
        in_specs=[
            pl.BlockSpec((1, C, L), lambda n: (n, 0, 0)),    # x (and residual)
            pl.BlockSpec((3, C, C), lambda n: (0, 0, 0)),    # w2 (resident)
            pl.BlockSpec((3, C, C), lambda n: (0, 0, 0)),    # w3 (resident)
            pl.BlockSpec((C, 1), lambda n: (0, 0)),          # bn2 scale
            pl.BlockSpec((C, 1), lambda n: (0, 0)),          # bn2 shift
            pl.BlockSpec((C, 1), lambda n: (0, 0)),          # bn3 scale
            pl.BlockSpec((C, 1), lambda n: (0, 0)),          # bn3 shift
        ],
        out_specs=pl.BlockSpec((1, C, L), lambda n: (n, 0, 0)),
        scratch_shapes=[
            pltpu.VMEM((C, L + 4), mm_dtype),   # padded input for conv2
            pltpu.VMEM((C, L + 2), mm_dtype),   # conv2->bn2->relu activation
        ],
    )

    out = pl.pallas_call(
        _bottleneck2_kernel,
        out_shape=jax.ShapeDtypeStruct((N, C, L), out_dtype),
        grid_spec=grid_spec,
        compiler_params=pltpu.CompilerParams(
            dimension_semantics=("parallel",),          # shard N across TCs
            vmem_limit_bytes=32 * 1024 * 1024,          # explicit (v7x-safe)
        ),
    )(x, w2_t, w3_t, s2b, b2b, s3b, b3b)

    return out


def ref_forward(x_ncl, w2, w3, s2, b2, s3, b3):
    """Pure-JAX reference (cross-correlation, like PyTorch Conv1d)."""
    dn = ("NCH", "OIH", "NCH")
    h = jax.lax.conv_general_dilated(x_ncl, w2, (1,), [(2, 2)],
                                     dimension_numbers=dn)
    h = h * s2[None, :, None] + b2[None, :, None]
    h = jnp.maximum(h, 0.0)
    o = jax.lax.conv_general_dilated(h, w3, (1,), [(0, 0)],
                                     dimension_numbers=dn)
    o = o * s3[None, :, None] + b3[None, :, None]
    o = o + x_ncl
    return jnp.maximum(o, 0.0)


if __name__ == "__main__":
    # Small shapes: batch=2, planes=4, length=16.  x has `planes` channels
    # (required by conv2 in the original module's default configuration).
    N, C, L = 2, 4, 16
    key = jax.random.PRNGKey(0)
    ks = jax.random.split(key, 12)

    x = jax.random.normal(ks[0], (N, C, L), jnp.float32)

    # Conv weights in PyTorch Conv1d layout (Cout, Cin, K), bias=False.
    w2 = 0.2 * jax.random.normal(ks[1], (C, C, 3), jnp.float32)
    w3 = 0.2 * jax.random.normal(ks[2], (C, C, 3), jnp.float32)

    # BatchNorm parameters (inference mode), folded into scale/shift.
    eps = 1e-5
    g2 = 1.0 + 0.1 * jax.random.normal(ks[3], (C,), jnp.float32)
    be2 = 0.1 * jax.random.normal(ks[4], (C,), jnp.float32)
    m2 = 0.1 * jax.random.normal(ks[5], (C,), jnp.float32)
    v2 = jnp.abs(jax.random.normal(ks[6], (C,), jnp.float32)) + 0.5
    g3 = 1.0 + 0.1 * jax.random.normal(ks[7], (C,), jnp.float32)
    be3 = 0.1 * jax.random.normal(ks[8], (C,), jnp.float32)
    m3 = 0.1 * jax.random.normal(ks[9], (C,), jnp.float32)
    v3 = jnp.abs(jax.random.normal(ks[10], (C,), jnp.float32)) + 0.5

    s2 = g2 / jnp.sqrt(v2 + eps)
    sh2 = be2 - m2 * s2
    s3 = g3 / jnp.sqrt(v3 + eps)
    sh3 = be3 - m3 * s3

    ref = ref_forward(x, w2, w3, s2, sh2, s3, sh3)

    # f32 path: tight tolerance.
    out = jax.block_until_ready(
        bottleneck2_pallas(x, w2, w3, s2, sh2, s3, sh3))
    assert out.shape == (N, C, L)
    assert jnp.allclose(out, ref, atol=1e-4, rtol=1e-4), (
        f"f32 max abs err {jnp.max(jnp.abs(out - ref))}")

    # bf16 matmul path (perf-review recommendation for v6e/v7x): loose check.
    out_bf16 = jax.block_until_ready(
        bottleneck2_pallas(x, w2, w3, s2, sh2, s3, sh3, use_bf16=True))
    assert out_bf16.shape == (N, C, L)
    assert jnp.allclose(out_bf16, ref, atol=1e-1, rtol=1e-1), (
        f"bf16 max abs err {jnp.max(jnp.abs(out_bf16 - ref))}")

    print("KERNEL_OK")
</pallas_src>

<mosaic_0001>
module attributes {stable_mosaic.version = 11 : i64} {
  func.func @_bottleneck2_kernel(%arg0: i32, %arg1: memref<1x4x16xf32, #tpu.memory_space<vmem>>, %arg2: memref<3x4x4xf32, #tpu.memory_space<vmem>>, %arg3: memref<3x4x4xf32, #tpu.memory_space<vmem>>, %arg4: memref<4x1xf32, #tpu.memory_space<vmem>>, %arg5: memref<4x1xf32, #tpu.memory_space<vmem>>, %arg6: memref<4x1xf32, #tpu.memory_space<vmem>>, %arg7: memref<4x1xf32, #tpu.memory_space<vmem>>, %arg8: memref<1x4x16xf32, #tpu.memory_space<vmem>>, %arg9: memref<4x20xf32, #tpu.memory_space<vmem>>, %arg10: memref<4x18xf32, #tpu.memory_space<vmem>>) attributes {dimension_semantics = [#tpu.dimension_semantics<parallel>], iteration_bounds = array<i64: 2>, scalar_prefetch = 0 : i64, scratch_operands = 2 : i64, tpu.core_type = #tpu.core_type<tc>, window_params = [{transform_indices = @transform_0, window_bounds = array<i64: 1, 4, 16>}, {pipeline_mode = #tpu.pipeline_mode<synchronous>, transform_indices = @transform_1, window_bounds = array<i64: 3, 4, 4>}, {pipeline_mode = #tpu.pipeline_mode<synchronous>, transform_indices = @transform_2, window_bounds = array<i64: 3, 4, 4>}, {pipeline_mode = #tpu.pipeline_mode<synchronous>, transform_indices = @transform_3, window_bounds = array<i64: 4, 1>}, {pipeline_mode = #tpu.pipeline_mode<synchronous>, transform_indices = @transform_4, window_bounds = array<i64: 4, 1>}, {pipeline_mode = #tpu.pipeline_mode<synchronous>, transform_indices = @transform_5, window_bounds = array<i64: 4, 1>}, {pipeline_mode = #tpu.pipeline_mode<synchronous>, transform_indices = @transform_6, window_bounds = array<i64: 4, 1>}, {transform_indices = @transform_7, window_bounds = array<i64: 1, 4, 16>}]} {
    %c0 = arith.constant 0 : index
    %c0_0 = arith.constant 0 : index
    %c0_1 = arith.constant 0 : index
    %0 = vector.load %arg1[%c0, %c0_0, %c0_1] : memref<1x4x16xf32, #tpu.memory_space<vmem>>, vector<1x4x16xf32>
    %1 = vector.shape_cast %0 : vector<1x4x16xf32> to vector<4x16xf32>
    %cst = arith.constant 0.000000e+00 : f32
    %2 = vector.broadcast %cst : f32 to vector<4x2xf32>
    %c0_2 = arith.constant 0 : index
    %c0_3 = arith.constant 0 : index
    %3 = vector.load %arg9[%c0_2, %c0_3] : memref<4x20xf32, #tpu.memory_space<vmem>>, vector<4x2xf32>
    tpu.vector_store %arg9[%c0_2, %c0_3], %2 {strides = array<i32>} : memref<4x20xf32, #tpu.memory_space<vmem>>, vector<4x2xf32>,
    %c0_4 = arith.constant 0 : index
    %c18 = arith.constant 18 : index
    %4 = vector.load %arg9[%c0_4, %c18] : memref<4x20xf32, #tpu.memory_space<vmem>>, vector<4x2xf32>
    tpu.vector_store %arg9[%c0_4, %c18], %2 {strides = array<i32>} : memref<4x20xf32, #tpu.memory_space<vmem>>, vector<4x2xf32>,
    %c0_5 = arith.constant 0 : index
    %c2 = arith.constant 2 : index
    %5 = vector.load %arg9[%c0_5, %c2] : memref<4x20xf32, #tpu.memory_space<vmem>>, vector<4x16xf32>
    tpu.vector_store %arg9[%c0_5, %c2], %1 {strides = array<i32>} : memref<4x20xf32, #tpu.memory_space<vmem>>, vector<4x16xf32>,
    %c0_6 = arith.constant 0 : index
    %c0_7 = arith.constant 0 : index
    %6 = vector.load %arg4[%c0_6, %c0_7] : memref<4x1xf32, #tpu.memory_space<vmem>>, vector<4x1xf32>
    %c0_8 = arith.constant 0 : index
    %c0_9 = arith.constant 0 : index
    %7 = vector.load %arg5[%c0_8, %c0_9] : memref<4x1xf32, #tpu.memory_space<vmem>>, vector<4x1xf32>
    %c0_10 = arith.constant 0 : index
    %c0_11 = arith.constant 0 : index
    %8 = vector.load %arg6[%c0_10, %c0_11] : memref<4x1xf32, #tpu.memory_space<vmem>>, vector<4x1xf32>
    %c0_12 = arith.constant 0 : index
    %c0_13 = arith.constant 0 : index
    %9 = vector.load %arg7[%c0_12, %c0_13] : memref<4x1xf32, #tpu.memory_space<vmem>>, vector<4x1xf32>
    %c0_14 = arith.constant 0 : index
    %c0_15 = arith.constant 0 : index
    %c0_16 = arith.constant 0 : index
    %10 = vector.load %arg2[%c0_14, %c0_15, %c0_16] : memref<3x4x4xf32, #tpu.memory_space<vmem>>, vector<1x4x4xf32>
    %11 = vector.shape_cast %10 : vector<1x4x4xf32> to vector<4x4xf32>
    %c0_17 = arith.constant 0 : index
    %c0_18 = arith.constant 0 : index
    %12 = vector.load %arg9[%c0_17, %c0_18] : memref<4x20xf32, #tpu.memory_space<vmem>>, vector<4x18xf32>
    %cst_19 = arith.constant dense<0.000000e+00> : vector<4x18xf32>
    %13 = tpu.matmul %11, %12, %cst_19 {dimension_numbers = #tpu.dot_dimension_numbers<[1], [0], [0], [1], [0, 0, 1, 1], [], []>} : vector<4x4xf32>, vector<4x18xf32>, vector<4x18xf32> -> vector<4x18xf32>
    %c1 = arith.constant 1 : index
    %c0_20 = arith.constant 0 : index
    %c0_21 = arith.constant 0 : index
    %14 = vector.load %arg2[%c1, %c0_20, %c0_21] : memref<3x4x4xf32, #tpu.memory_space<vmem>>, vector<1x4x4xf32>
    %15 = vector.shape_cast %14 : vector<1x4x4xf32> to vector<4x4xf32>
    %c0_22 = arith.constant 0 : index
    %c1_23 = arith.constant 1 : index
    %16 = vector.load %arg9[%c0_22, %c1_23] : memref<4x20xf32, #tpu.memory_space<vmem>>, vector<4x18xf32>
    %cst_24 = arith.constant dense<0.000000e+00> : vector<4x18xf32>
    %17 = tpu.matmul %15, %16, %cst_24 {dimension_numbers = #tpu.dot_dimension_numbers<[1], [0], [0], [1], [0, 0, 1, 1], [], []>} : vector<4x4xf32>, vector<4x18xf32>, vector<4x18xf32> -> vector<4x18xf32>
    %18 = arith.addf %13, %17 : vector<4x18xf32>
    %c2_25 = arith.constant 2 : index
    %c0_26 = arith.constant 0 : index
    %c0_27 = arith.constant 0 : index
    %19 = vector.load %arg2[%c2_25, %c0_26, %c0_27] : memref<3x4x4xf32, #tpu.memory_space<vmem>>, vector<1x4x4xf32>
    %20 = vector.shape_cast %19 : vector<1x4x4xf32> to vector<4x4xf32>
    %c0_28 = arith.constant 0 : index
    %c2_29 = arith.constant 2 : index
    %21 = vector.load %arg9[%c0_28, %c2_29] : memref<4x20xf32, #tpu.memory_space<vmem>>, vector<4x18xf32>
    %cst_30 = arith.constant dense<0.000000e+00> : vector<4x18xf32>
    %22 = tpu.matmul %20, %21, %cst_30 {dimension_numbers = #tpu.dot_dimension_numbers<[1], [0], [0], [1], [0, 0, 1, 1], [], []>} : vector<4x4xf32>, vector<4x18xf32>, vector<4x18xf32> -> vector<4x18xf32>
    %23 = arith.addf %18, %22 : vector<4x18xf32>
    %24 = vector.broadcast %6 : vector<4x1xf32> to vector<4x18xf32>
    %25 = arith.mulf %23, %24 : vector<4x18xf32>
    %26 = vector.broadcast %7 : vector<4x1xf32> to vector<4x18xf32>
    %27 = arith.addf %25, %26 : vector<4x18xf32>
    %cst_31 = arith.constant 0.000000e+00 : f32
    %28 = vector.broadcast %cst_31 : f32 to vector<4x18xf32>
    %29 = arith.maximumf %27, %28 : vector<4x18xf32>
    %c0_32 = arith.constant 0 : index
    %c0_33 = arith.constant 0 : index
    %30 = vector.load %arg10[%c0_32, %c0_33] : memref<4x18xf32, #tpu.memory_space<vmem>>, vector<4x18xf32>
    tpu.vector_store %arg10[%c0_32, %c0_33], %29 {strides = array<i32>} : memref<4x18xf32, #tpu.memory_space<vmem>>, vector<4x18xf32>,
    %c0_34 = arith.constant 0 : index
    %c0_35 = arith.constant 0 : index
    %c0_36 = arith.constant 0 : index
    %31 = vector.load %arg3[%c0_34, %c0_35, %c0_36] : memref<3x4x4xf32, #tpu.memory_space<vmem>>, vector<1x4x4xf32>
    %32 = vector.shape_cast %31 : vector<1x4x4xf32> to vector<4x4xf32>
    %c0_37 = arith.constant 0 : index
    %c0_38 = arith.constant 0 : index
    %33 = vector.load %arg10[%c0_37, %c0_38] : memref<4x18xf32, #tpu.memory_space<vmem>>, vector<4x16xf32>
    %cst_39 = arith.constant dense<0.000000e+00> : vector<4x16xf32>
    %34 = tpu.matmul %32, %33, %cst_39 {dimension_numbers = #tpu.dot_dimension_numbers<[1], [0], [0], [1], [0, 0, 1, 1], [], []>} : vector<4x4xf32>, vector<4x16xf32>, vector<4x16xf32> -> vector<4x16xf32>
    %c1_40 = arith.constant 1 : index
    %c0_41 = arith.constant 0 : index
    %c0_42 = arith.constant 0 : index
    %35 = vector.load %arg3[%c1_40, %c0_41, %c0_42] : memref<3x4x4xf32, #tpu.memory_space<vmem>>, vector<1x4x4xf32>
    %36 = vector.shape_cast %35 : vector<1x4x4xf32> to vector<4x4xf32>
    %c0_43 = arith.constant 0 : index
    %c1_44 = arith.constant 1 : index
    %37 = vector.load %arg10[%c0_43, %c1_44] : memref<4x18xf32, #tpu.memory_space<vmem>>, vector<4x16xf32>
    %cst_45 = arith.constant dense<0.000000e+00> : vector<4x16xf32>
    %38 = tpu.matmul %36, %37, %cst_45 {dimension_numbers = #tpu.dot_dimension_numbers<[1], [0], [0], [1], [0, 0, 1, 1], [], []>} : vector<4x4xf32>, vector<4x16xf32>, vector<4x16xf32> -> vector<4x16xf32>
    %39 = arith.addf %34, %38 : vector<4x16xf32>
    %c2_46 = arith.constant 2 : index
    %c0_47 = arith.constant 0 : index
    %c0_48 = arith.constant 0 : index
    %40 = vector.load %arg3[%c2_46, %c0_47, %c0_48] : memref<3x4x4xf32, #tpu.memory_space<vmem>>, vector<1x4x4xf32>
    %41 = vector.shape_cast %40 : vector<1x4x4xf32> to vector<4x4xf32>
    %c0_49 = arith.constant 0 : index
    %c2_50 = arith.constant 2 : index
    %42 = vector.load %arg10[%c0_49, %c2_50] : memref<4x18xf32, #tpu.memory_space<vmem>>, vector<4x16xf32>
    %cst_51 = arith.constant dense<0.000000e+00> : vector<4x16xf32>
    %43 = tpu.matmul %41, %42, %cst_51 {dimension_numbers = #tpu.dot_dimension_numbers<[1], [0], [0], [1], [0, 0, 1, 1], [], []>} : vector<4x4xf32>, vector<4x16xf32>, vector<4x16xf32> -> vector<4x16xf32>
    %44 = arith.addf %39, %43 : vector<4x16xf32>
    %45 = vector.broadcast %8 : vector<4x1xf32> to vector<4x16xf32>
    %46 = arith.mulf %44, %45 : vector<4x16xf32>
    %47 = vector.broadcast %9 : vector<4x1xf32> to vector<4x16xf32>
    %48 = arith.addf %46, %47 : vector<4x16xf32>
    %49 = arith.addf %48, %1 : vector<4x16xf32>
    %cst_52 = arith.constant 0.000000e+00 : f32
    %50 = vector.broadcast %cst_52 : f32 to vector<4x16xf32>
    %51 = arith.maximumf %49, %50 : vector<4x16xf32>
    %c0_53 = arith.constant 0 : index
    %c0_54 = arith.constant 0 : index
    %c0_55 = arith.constant 0 : index
    %52 = vector.load %arg8[%c0_53, %c0_54, %c0_55] : memref<1x4x16xf32, #tpu.memory_space<vmem>>, vector<1x4x16xf32>
    %53 = vector.shape_cast %52 : vector<1x4x16xf32> to vector<4x16xf32>
    %54 = vector.shape_cast %51 : vector<4x16xf32> to vector<1x4x16xf32>
    tpu.vector_store %arg8[%c0_53, %c0_54, %c0_55], %54 {strides = array<i32>} : memref<1x4x16xf32, #tpu.memory_space<vmem>>, vector<1x4x16xf32>,
    return
  }
  func.func @transform_0(%arg0: i32) -> (i32, i32, i32) {
    %c0_i32 = arith.constant 0 : i32
    %c0_i32_0 = arith.constant 0 : i32
    %c0_i32_1 = arith.constant 0 : i32
    return %arg0, %c0_i32, %c0_i32_0 : i32, i32, i32
  }
  func.func @transform_1(%arg0: i32) -> (i32, i32, i32) {
    %c0_i32 = arith.constant 0 : i32
    %c0_i32_0 = arith.constant 0 : i32
    %c0_i32_1 = arith.constant 0 : i32
    %c0_i32_2 = arith.constant 0 : i32
    return %c0_i32, %c0_i32_0, %c0_i32_1 : i32, i32, i32
  }
  func.func @transform_2(%arg0: i32) -> (i32, i32, i32) {
    %c0_i32 = arith.constant 0 : i32
    %c0_i32_0 = arith.constant 0 : i32
    %c0_i32_1 = arith.constant 0 : i32
    %c0_i32_2 = arith.constant 0 : i32
    return %c0_i32, %c0_i32_0, %c0_i32_1 : i32, i32, i32
  }
  func.func @transform_3(%arg0: i32) -> (i32, i32) {
    %c0_i32 = arith.constant 0 : i32
    %c0_i32_0 = arith.constant 0 : i32
    %c0_i32_1 = arith.constant 0 : i32
    return %c0_i32, %c0_i32_0 : i32, i32
  }
  func.func @transform_4(%arg0: i32) -> (i32, i32) {
    %c0_i32 = arith.constant 0 : i32
    %c0_i32_0 = arith.constant 0 : i32
    %c0_i32_1 = arith.constant 0 : i32
    return %c0_i32, %c0_i32_0 : i32, i32
  }
  func.func @transform_5(%arg0: i32) -> (i32, i32) {
    %c0_i32 = arith.constant 0 : i32
    %c0_i32_0 = arith.constant 0 : i32
    %c0_i32_1 = arith.constant 0 : i32
    return %c0_i32, %c0_i32_0 : i32, i32
  }
  func.func @transform_6(%arg0: i32) -> (i32, i32) {
    %c0_i32 = arith.constant 0 : i32
    %c0_i32_0 = arith.constant 0 : i32
    %c0_i32_1 = arith.constant 0 : i32
    return %c0_i32, %c0_i32_0 : i32, i32
  }
  func.func @transform_7(%arg0: i32) -> (i32, i32, i32) {
    %c0_i32 = arith.constant 0 : i32
    %c0_i32_0 = arith.constant 0 : i32
    %c0_i32_1 = arith.constant 0 : i32
    return %arg0, %c0_i32, %c0_i32_0 : i32, i32, i32
  }
}

</mosaic_0001>

<bundles_post_ra>
// kernel: tpu_custom_call.1
= control target key start
LH: loop header
LB: loop body
LE: loop exit
PB: predicated region body
PF: predicated region fallthrough
CT: control target
= control target key end

     0   :  { %12 = vsyncpa [#allocation5], 0  ;;  %s1413_s0 = inlined_call_operand.hbm [shape: f32[2,4,16], index: 0, kind: input, shape index: {}]   ;;  %s1414_s1 = inlined_call_operand.vmem [shape: f32[3,4,4], index: 1, kind: input, shape index: {}]   ;;  %s1415_s2 = inlined_call_operand.vmem [shape: f32[3,4,4], index: 2, kind: input, shape index: {}]   ;;  %s1416_s3 = inlined_call_operand.vmem [shape: f32[4,1], index: 3, kind: input, shape index: {}]   ;;  %s1417_s4 = inlined_call_operand.vmem [shape: f32[4,1], index: 4, kind: input, shape index: {}]   ;;  %s1418_s5 = inlined_call_operand.vmem [shape: f32[4,1], index: 5, kind: input, shape index: {}]   ;;  %s1419_s6 = inlined_call_operand.vmem [shape: f32[4,1], index: 6, kind: input, shape index: {}]   ;;  %s1420_s7 = inlined_call_operand.hbm [shape: f32[2,4,16], index: 7, kind: output, shape index: {}]  }
   0x1   :  { %14 = vsyncpa [#allocation5 + $0x1], 0 }
   0x2   :  { %15 = vsyncpa [#allocation6], 0 }
   0x3   :  { %17 = vsyncpa [#allocation6 + $0x1], 0  ;;  %s1178_s24 = smov 0   ;;  %s1180_s25 = smov 0  }
   0x4   :  { %s1182_s26 = smov 0   ;;  %s1184_s27 = smov 0  }
   0x5 LB: > { %s1199_s28 = sadd.s32 4294967295, %s1128_s27   ;;  %s900_s29 = sadd.s32 4294967294, %s1128_s27   ;;  %s1128_s27 = sphi %s1184_s27, %s1435_s27   ;;  %s1124_s26 = sphi %s1182_s26, %s1434_s26   ;;  %s1120_s25 = sphi %s1180_s25, %s1433_s25   ;;  %s1116_s24 = sphi %s1178_s24, %s1432_s24  }
   0x6   : > { %s1203_s30 = sadd.s32 1, %s1128_s27   ;;  %s30_s8 = sadd.s32 1, %s1124_s26 }
   0x7   : > { %s27_s9 = ssub.s32 %s1128_s27, %s1203_s30  ;;  %p37_p0 = scmp.ne.s32.totalorder %s1124_s26, %s1120_s25 }
   0x8   : > { %p28_p1 = scmp.eq.s32.totalorder %s27_s9, 0  ;;  %p38_p2 = scmp.eq.s32.totalorder %s1128_s27, 0 }
   0x9   : > { %p43_p3 = scmp.ne.s32.totalorder %s1120_s25, %s1116_s24  ;;  %p44_p4 = scmp.eq.s32.totalorder %s1199_s28, 0 }
   0xa   : > { %s1215_s10 = scalar_select %p28_p1, %s1124_s26, %s30_s8  }
   0xb   : > { %p1217_p5 = por %p38_p2, %p37_p0  ;;  %p1221_p6 = por %p44_p4, %p43_p3 }
   0xc   : > { %p193_p7 = scmp.eq.s32.totalorder %s1199_s28, 1  ;;  %p199_p8 = scmp.eq.s32.totalorder %s900_s29, 1 }
   0xd   : > { %p990_p10 = scmp.lt.s32.totalorder %s1128_s27, 2  ;;  %s237_s15 = sand.u32 1, %s1124_s26  }
   0xe   : > { %p1228_p11 = por %p193_p7, %p37_p0  ;;  %p1232_p12 = por %p199_p8, %p43_p3 }
   0xf   : > { %s904_s16 = sshll.u32 %s1128_s27, 6  ;;  %s903_s17 = sshll.u32 %s237_s15, 2 }
  0x10   : > { %s1424_s13 = scalar_select %p1228_p11, 1, 0 }
  0x11   : > { %s1425_s14 = scalar_select %p1232_p12, 1, 0 }
  0x12   : > { %s1241_s20 = scalar_lea.hbm %s1413_s0, %s904_s16  ;;  %s241_s21 = scalar_lea.vmem [#allocation4], %s903_s17 }
  0x13   : > { %s248_s22 = sshll.u32 %s241_s21, 4  ;;  %p1245_p13 = pnand %p990_p10, %p1217_p5  ;;  %s1249_s22 = int_to_ptr.vmem [resolvable:$true] %s248_s22 }
  0x14   : > { %s238_s29 = scalar_lea.sflag [#allocation5], %s237_s15  ;;  %s1032_s8 = scalar_lea.hbm %s1241_s20, 64 }
  0x15   : > { %p1033_p2 = scmp.ne.s32.totalorder %s1241_s20, %s1032_s8  ;;  %p1034_p3 = pneg %p1245_p13 }
  0x16   : > { %s1037_s16 = scalar_lea.hbm %s1413_s0, 128  ;;  %p1038_p5 = scmp.lt.u32.totalorder %s1241_s20, %s1413_s0 }
  0x17   : > { %p1035_p4 = pnand %p1034_p3, %p1033_p2  ;;  %p1039_p8 = scmp.lt.u32.totalorder %s1037_s16, %s1032_s8 }
  0x18   : > { %p1041_p9 = scmp.lt.u32.totalorder %s1032_s8, %s1241_s20 }
  0x19   : > { %p1036_p7 = pneg %p1035_p4  ;;  %p1040_p10 = por %p1039_p8, %p1038_p5 }
  0x1b   : > { %p1042_p0 = por %p1041_p9, %p1040_p10 }
  0x1d   : > { %p1043_p1 = pnand %p1042_p0, %p1036_p7 }
  0x1f   : > { %1046 = shalt.err (!%p1043_p1)
}
  0x20   : > { %s1047_s15 = scalar_lea.vmem %s1249_s22, 64  ;;  %s1130_s19 = smov [#allocation4]  }
  0x21   : > { %p1048_p2 = scmp.ne.s32.totalorder %s1249_s22, %s1047_s15  ;;  %s1052_s21 = sshll.u32 %s1130_s19, 4  ;;  %s1053_s21 = int_to_ptr.vmem [resolvable:$false] %s1052_s21 }
  0x22   : > { %s1054_s9 = scalar_lea.vmem %s1053_s21, 128  ;;  %p1055_p11 = scmp.lt.s32.totalorder %s1249_s22, %s1053_s21 }
  0x23   : > { %p1050_p4 = pnand %p1048_p2, %p1034_p3  ;;  %p1056_p5 = scmp.lt.s32.totalorder %s1054_s9, %s1047_s15 }
  0x25   : > { %p1051_p12 = pneg %p1050_p4  ;;  %p1057_p8 = por %p1056_p5, %p1055_p11 }
  0x27   : > { %p1058_p9 = pnand %p1057_p8, %p1051_p12 }
  0x29   : > { %1061 = shalt.err (!%p1058_p9)
}
  0x2a   : > { %985 = dma.hbm_to_vmem [thread:$0]  (!%p1245_p13), %s1241_s20, 64, %s1249_s22, %s238_s29  }
  0x2b   : > { %p1427_p0 = scmp.lt.s32.totalorder %s1128_s27, 3  ;;  %p1428_p1 = scmp.ge.s32.totalorder %s1128_s27, 1 }
  0x2d   : > { %p254_p3 = pnand %p1428_p1, %p1427_p0 }
  0x2e   : > { %s1283_s8 = sand.u32 (!%p254_p3), 1, %s1120_s25  }
  0x2f   : > { %257 = sbr.rel (%p254_p3) target bundleno = 904 (0x388), region = 48  ;;  %s906_s11 = sshll.u32 (!%p254_p3), %s1283_s8, 2 }
  0x30   : > { %s260_s16 = scalar_lea.sflag (!%p254_p3), [#allocation5], %s1283_s8  ;;  %s263_s23 = scalar_lea.vmem (!%p254_p3), [#allocation4], %s906_s11 }
  0x36   : > { %1107 = dma.done.wait (%p1221_p6), %s260_s16, 64  }
  0x37   : > { %1109 = vsyncadd (%p1221_p6), %s260_s16, 4294967232  ;;  %vm295_vm0 = vcmask 11264   ;;  %vm297_vm1 = vcmask 158864   ;;  %v1131_v0 = vmov 0.0   ;;  %v1297_v1 = vld [vmem:[%s263_s23] sm:$0xf] }
  0x38   : > { %296 = vst.msk [vmem:[#allocation2] sm:$0xf] %vm295_vm0, %v1131_v0  ;;  %940 = vmatprep.subr.mxu0 %v1131_v0  ;;  %955 = vmatprep.subr.mxu1 %v1131_v0  ;;  %s1132_s20 = smov 2   ;;  %vm1133_vm2 = vmmov 0   ;;  %vm303_vm3 = vcmask 142352   ;;  %s1134_s12 = smov 126  }
  0x39   : > { %298 = vst.msk [vmem:[#allocation2] sm:$0xf] %vm297_vm1, %v1131_v0  ;;  %300 = vrot.lane.b32.xlu0 %v1297_v1, %s1132_s20  ;;  %942 = vmatprep.mubr.msk.f32.mxu0 %vm1133_vm2, %v1131_v0  ;;  %s1135_s22 = smov 127   ;;  %v306_v4 = vld [vmem:[%s1417_s4] sm:$0xf]  ;;  %v1136_v6 = vmov 0  }
  0x3a   : > { %957 = vmatprep.mubr.msk.f32.mxu1 %vm1133_vm2, %v1131_v0  ;;  %v305_v5 = vld [vmem:[%s1416_s3] sm:$0xf]  ;;  %1031 = vset.pattern.permute.xlu0 %v1136_v6  ;;  %vm320_vm4 = vcmask 1043456   ;;  %v908_v8 = vld [vmem:[%s1414_s1 + $0x4] sm:$0xf]  ;;  %vm316_vm5 = vcmask 31744  }
  0x3b   : > { %1030 = vset.pattern.permute.xlu1 %v1136_v6  ;;  %v307_v7 = vld [vmem:[%s1418_s5] sm:$0xf]  ;;  %v913_v12 = vld [vmem:[%s1414_s1 + $0x8] sm:$0xf]  ;;  %vm561_vm6 = vcmask 142336   ;;  %s925_s23 = sshll.u32 %s1199_s28, 6 }
  0x3c   : > { %v309_v10 = vld [vmem:[%s1414_s1] sm:$0xf]  ;;  %v916_v22 = vld [vmem:[%s1415_s2 + $0x4] sm:$0xf]  ;;  %v921_v26 = vld [vmem:[%s1415_s2 + $0x8] sm:$0xf]  ;;  %s1369_s15 = scalar_lea.hbm %s1420_s7, %s925_s23 }
  0x3d   : > { %v308_v21 = vld [vmem:[%s1419_s6] sm:$0xf]  ;;  %s293_s20 = scalar_lea.vmem [#allocation7], %s906_s11  ;;  %vm814_vm7 = vcmask 125952   ;;  %s817_s19 = scalar_lea.sflag [#allocation6], %s1283_s8 }
  0x3e   : > { %v563_v24 = vld [vmem:[%s1415_s2] sm:$0xf]  ;;  %s830_s29 = sshll.u32 %s293_s20, 4  ;;  %p1429_p11 = scmp.ne.s32.totalorder %s1424_s13, 0  ;;  %s1371_s29 = int_to_ptr.vmem [resolvable:$true] %s830_s29 }
  0x3f   : > { %s1062_s28 = scalar_lea.vmem %s1371_s29, 64  ;;  %s1137_s11 = smov [#allocation7]  }
  0x40   : > { %p1063_p6 = scmp.ne.s32.totalorder %s1371_s29, %s1062_s28  ;;  %s1066_s21 = sshll.u32 %s1137_s11, 4  ;;  %s1067_s21 = int_to_ptr.vmem [resolvable:$false] %s1066_s21 }
  0x41   : > { %p1069_p7 = scmp.lt.s32.totalorder %s1371_s29, %s1067_s21 }
  0x42   : > { %p1064_p12 = pnand %p1063_p6, %p1429_p11 }
  0x44   : > { %p1065_p13 = pneg %p1064_p12 }
  0xab   : > { %v301_v2 = vpop.permute.xlu0 %300 }
  0xac   : > { %304 = vst.msk [vmem:[#allocation2] sm:$0xf] %vm303_vm3, %v301_v2 }
  0xb3   : > { %v310_v3 = vld [vmem:[#allocation2] sm:$0xf] }
  0xb4   : > { %470 = vrot.lane.b32.xlu1 %v310_v3, %s1134_s12  ;;  %314 = vrot.lane.b32.xlu0 %v310_v3, %s1135_s22 }
  0xb8   : > { %556 = vperm.xlu0 %1031, %v306_v4   ;;  %550 = vperm.xlu1 %1030, %v305_v5  }
  0xbc   : > { %802 = vperm.xlu0 %1031, %v307_v7  }
 0x126   : > { %v315_v9 = vpop.permute.xlu0 %314  ;;  %v471_v11 = vpop.permute.xlu1 %470 }
 0x127   : > { %941 = vmatpush3.msk.msra.mxu0 %vm320_vm4, %v315_v9 }
 0x128   : > { %943 = vmatmul.mubr.msk.f32.vlgmr.msra.gmra.mrb[0].mxu0 %vm316_vm5, %v908_v8  ;;  %945 = vmatprep.subr.mxu0 %v1131_v0 }
 0x129   : > { %946 = vmatpush3.msk.msra.mxu0 %vm320_vm4, %v310_v3  ;;  %947 = vmatprep.mubr.msk.f32.mxu0 %vm1133_vm2, %v1131_v0 }
 0x12a   : > { %950 = vmatprep.subr.mxu0 %v1131_v0 }
 0x130   : > { %948 = vmatmul.mubr.msk.f32.vlgmr.msra.gmra.mrb[0].mxu0 %vm316_vm5, %v309_v10 }
 0x131   : > { %951 = vmatpush3.msk.msra.mxu0 %vm320_vm4, %v471_v11  ;;  %952 = vmatprep.mubr.msk.f32.mxu0 %vm1133_vm2, %v1131_v0 }
 0x137   : > { %v551_v13 = vpop.permute.xlu1 %550  ;;  %v557_v17 = vpop.permute.xlu0 %556 }
 0x138   : > { %953 = vmatmul.mubr.msk.f32.vlgmr.msra.gmra.mrb[0].mxu0 %vm316_vm5, %v913_v12 }
 0x13b   : > { %v803_v27 = vpop.permute.xlu0 %802 }
 0x20b   : > { %v543_v14 = vpop.f32.mrb[0].mxu0 }
 0x20c   : > { %v553_v15 = vmul.f32 %v551_v13, %v543_v14  ;;  %v954_v16 = vpop.f32.mrb[1].mxu0 }
 0x20e   : > { %v559_v18 = vadd.f32 %v557_v17, %v553_v15 }
 0x210   : > { %v560_v19 = vmax.f32 %v559_v18, 0.0 }
 0x212   : > { %562 = vst.msk [vmem:[#allocation3] sm:$0xf] %vm561_vm6, %v560_v19 }
 0x219   : > { %v564_v20 = vld [vmem:[#allocation3] sm:$0xf] }
 0x21a   : > { %568 = vrot.lane.b32.xlu1 %v564_v20, %s1135_s22 }
 0x21e   : > { %722 = vrot.lane.b32.xlu1 %v564_v20, %s1134_s12  ;;  %s1068_s12 = scalar_lea.vmem %s1067_s21, 128 }
 0x21f   : > { %p1070_p10 = scmp.lt.s32.totalorder %s1068_s12, %s1062_s28 }
 0x221   : > { %p1071_p2 = por %p1070_p10, %p1069_p7 }
 0x222   : > { %808 = vperm.xlu1 %1030, %v308_v21  }
 0x223   : > { %p1072_p4 = pnand %p1071_p2, %p1065_p13 }
 0x28c   : > { %v569_v23 = vpop.permute.xlu1 %568 }
 0x28d   : > { %956 = vmatpush3.msk.msra.mxu1 %vm320_vm4, %v569_v23 }
 0x28e   : > { %958 = vmatmul.mubr.msk.f32.vlgmr.msra.gmra.mrb[0].mxu1 %vm316_vm5, %v916_v22  ;;  %960 = vmatprep.subr.mxu1 %v1131_v0 }
 0x28f   : > { %961 = vmatpush3.msk.msra.mxu1 %vm320_vm4, %v564_v20  ;;  %962 = vmatprep.mubr.msk.f32.mxu1 %vm1133_vm2, %v1131_v0 }
 0x290   : > { %965 = vmatprep.subr.mxu1 %v1131_v0  ;;  %v723_v25 = vpop.permute.xlu1 %722 }
 0x296   : > { %963 = vmatmul.mubr.msk.f32.vlgmr.msra.gmra.mrb[0].mxu1 %vm316_vm5, %v563_v24 }
 0x297   : > { %966 = vmatpush3.msk.msra.mxu1 %vm320_vm4, %v723_v25  ;;  %967 = vmatprep.mubr.msk.f32.mxu1 %vm1133_vm2, %v1131_v0 }
 0x29e   : > { %968 = vmatmul.mubr.msk.f32.vlgmr.msra.gmra.mrb[0].mxu1 %vm316_vm5, %v921_v26 }
 0x2a1   : > { %v809_v31 = vpop.permute.xlu1 %808 }
 0x371   : > { %v795_v28 = vpop.f32.mrb[0].mxu1 }
 0x372   : > { %v805_v29 = vmul.f32 %v803_v27, %v795_v28  ;;  %v969_v30 = vpop.f32.mrb[1].mxu1 }
 0x374   : > { %v811_v32 = vadd.f32 %v809_v31, %v805_v29 }
 0x376   : > { %v812_v33 = vadd.f32 %v811_v32, %v1297_v1 }
 0x378   : > { %v813_v34 = vmax.f32 %v812_v33, 0.0 }
 0x37a   : > { %815 = vst.msk [vmem:[%s293_s20] sm:$0xf] %vm814_vm7, %v813_v34 }
 0x37b   : > { %1075 = shalt.err (!%p1072_p4)
}
 0x37c   : > { %s1076_s8 = scalar_lea.hbm %s1369_s15, 64  ;;  %s1080_s16 = scalar_lea.hbm %s1420_s7, 128 }
 0x37d   : > { %p1077_p5 = scmp.ne.s32.totalorder %s1369_s15, %s1076_s8  ;;  %p1081_p0 = scmp.lt.u32.totalorder %s1369_s15, %s1420_s7 }
 0x37e   : > { %p1082_p1 = scmp.lt.u32.totalorder %s1080_s16, %s1076_s8  ;;  %p1084_p6 = scmp.lt.u32.totalorder %s1076_s8, %s1369_s15 }
 0x37f   : > { %p1078_p8 = pnand %p1077_p5, %p1429_p11 }
 0x380   : > { %p1083_p3 = por %p1082_p1, %p1081_p0 }
 0x381   : > { %p1079_p9 = pneg %p1078_p8 }
 0x382   : > { %p1085_p12 = por %p1084_p6, %p1083_p3 }
 0x384   : > { %p1086_p13 = pnand %p1085_p12, %p1079_p9 }
 0x386   : > { %1089 = shalt.err (!%p1086_p13)
}
 0x387   : > { %980 = dma.vmem_to_hbm [thread:$0]  (%p1429_p11), %s1371_s29, 64, %s1369_s15, %s817_s19  }
 0x388 PF: > { %s842_s17 = sand.u32 1, %s1116_s24   ;;  %p1430_p7 = scmp.ne.s32.totalorder %s1425_s14, 0 }
 0x389   : > { %p1431_p10 = scmp.ge.s32.totalorder %s1128_s27, 2  ;;  %s843_s18 = scalar_lea.sflag [#allocation6], %s842_s17 }
 0x38b   : > { %p987_p2 = pnand %p1431_p10, %p1430_p7 }
 0x38d   : > { %1111 = dma.done.wait (!%p987_p2), %s843_s18, 64  }
 0x38e   : > { %1113 = vsyncadd (!%p987_p2), %s843_s18, 4294967232  ;;  %p20_p4 = scmp.ge.s32.totalorder %s1203_s30, 4   ;;  %s1432_s24 = smov %s1120_s25 }
 0x38f   : > { %s1433_s25 = smov %s1124_s26  ;;  %s1434_s26 = smov %s1215_s10 }
 0x390   : > { %s1435_s27 = smov %s1203_s30  ;;  %22 = sbr.rel (!%p20_p4) target bundleno = 5 (0x5), region = 97 }
 0x397   :  { %848 = vsyncpa [#allocation5], 1 }
 0x398   :  { %850 = vsyncpa [#allocation5 + $0x1], 1 }
 0x399   :  { %851 = vsyncpa [#allocation6], 1 }
 0x39a   :  { %853 = vsyncpa [#allocation6 + $0x1], 1 }

</bundles_post_ra>
